<compile_context>
chip_gen: v5e
topology: v5e:2x2
jax: 0.10.0
libtpu: 0.0.40
codegen_flags: <defaults>
</compile_context>

<pallas_src>
import functools

import numpy as np
import jax
import jax.numpy as jnp
from jax import lax
from jax.experimental import pallas as pl
from jax.experimental.pallas import tpu as pltpu

_EPS = 1.0 / 255.0


def _recip(x):
    """Reciprocal via the EUP approximate unit plus one Newton step (~f32 accurate)."""
    r = pl.reciprocal(x, approx=True)
    return r * (2.0 - x * r)


def _iqa_kernel(av2_ref, aht2_ref, x_ref, o_ref, *, pool, exposed):
    """av2_ref : [H, 2H] bf16  == [Av | Av]      (vertical pass, hi/lo folded into K).
       aht2_ref: [2W, W] bf16  == [Ah^T ; Ah^T]  (horizontal pass, hi/lo folded into K).
       x_ref   : [BT, C, H, W] batch tile, original dtype, unpadded.
       o_ref   : [BT, H, W]    quality maps (channel dim squeezed by the BlockSpec)."""
    x = x_ref[...].astype(jnp.float32)                       # [BT, C, H, W]
    BT, C, H, W = x.shape

    # --- per-pixel channel statistics; unrolled over the small static C so every
    #     intermediate stays rank <= 3 (no rank-4 middle-axis reductions) ---
    x0 = x[:, 0]
    max_rgb, min_rgb = x0, x0
    acc, acc2 = x0, x0 * x0
    for c in range(1, C):
        xc = x[:, c]
        max_rgb = jnp.maximum(max_rgb, xc)
        min_rgb = jnp.minimum(min_rgb, xc)
        acc = acc + xc
        acc2 = acc2 + xc * xc
    inv_c = 1.0 / float(C)

    saturation = (max_rgb - min_rgb + _EPS) * _recip(max_rgb + _EPS)   # [BT, H, W]
    sat2d = saturation.reshape(BT * H, W)

    xm = (acc * inv_c).reshape(BT * H, W)                    # E[x]   over C, [BT*H, W]
    x2m = (acc2 * inv_c).reshape(BT * H, W)                  # E[x^2] over C

    # --- horizontal pass: ONE MXU call.
    #     M = 2*BT*H (batch + {x, x^2} folded into sublanes); K = 2W because the exact
    #     bf16 hi+lo pair of the data is folded into the contraction dim against
    #     [Ah^T ; Ah^T].  Accumulation stays f32 (native bf16 x bf16 -> f32 MXU mode).
    s = jnp.concatenate([xm, x2m], axis=0)                   # [2*BT*H, W] f32
    s_hi = s.astype(jnp.bfloat16)
    s_lo = (s - s_hi.astype(jnp.float32)).astype(jnp.bfloat16)
    s_hl = jnp.concatenate([s_hi, s_lo], axis=1)             # [2*BT*H, 2W]
    t = jnp.dot(s_hl, aht2_ref[...], preferred_element_type=jnp.float32)   # [2*BT*H, W]

    # --- vertical pass: ONE MXU call.
    #     The 2*BT filtered quantities are lane-stacked (N = 2*BT*W) and the exact bf16
    #     hi+lo pair is folded into K against [Av | Av].
    nq = 2 * BT
    u = jnp.concatenate([t[q * H:(q + 1) * H, :] for q in range(nq)], axis=1)   # [H, 2*BT*W]
    u_hi = u.astype(jnp.bfloat16)
    u_lo = (u - u_hi.astype(jnp.float32)).astype(jnp.bfloat16)
    u_hl = jnp.concatenate([u_hi, u_lo], axis=0)             # [2H, 2*BT*W]
    inv_area = 1.0 / float(pool * pool)
    p = jnp.dot(av2_ref[...], u_hl, preferred_element_type=jnp.float32) * inv_area   # [H, 2*BT*W]

    # un-stack: lane-blocks [0, BT) hold pooled E[x], [BT, 2*BT) hold pooled E[x^2]
    mean_rgb = jnp.concatenate([p[:, b * W:(b + 1) * W] for b in range(BT)], axis=0)         # [BT*H, W]
    mean_sq = jnp.concatenate([p[:, (BT + b) * W:(BT + b + 1) * W] for b in range(BT)], axis=0)

    exposedness = jnp.abs(mean_rgb - exposed) + _EPS
    contrast = mean_sq - mean_rgb * mean_rgb
    quality = sat2d * contrast * _recip(exposedness)         # [BT*H, W]
    o_ref[...] = quality.reshape(BT, H, W).astype(o_ref.dtype)


def _reflect_box_matrix(n, pad, pool):
    """M[i, r] = number of taps of the stride-1, length-`pool` window over the
    reflection-padded axis (output index i) that read input index r.
    Entries are tiny integers (<= pool) -> exact in bf16."""
    eye = np.eye(n, dtype=np.float64)
    eye_p = np.pad(eye, ((pad, pad), (0, 0)), mode="reflect")        # [n + 2*pad, n]
    csum = np.concatenate([np.zeros((1, n)), np.cumsum(eye_p, axis=0)], axis=0)
    return csum[pool:] - csum[:-pool]                                # [n, n] (odd pool)


def _choose_batch_tile(B, C, H, W, itemsize, budget_bytes=8 * 2**20):
    """Largest divisor of B whose per-step working set stays under a VMEM budget."""
    per_image = C * H * W * max(int(itemsize), 4) + 10 * H * W * 4   # input + f32 temporaries
    cap = max(1, int(budget_bytes // max(per_image, 1)))
    for bt in range(min(B, cap), 0, -1):
        if B % bt == 0:
            return bt
    return 1


def image_quality_assessment(images, exposed_level=0.5, pool_size=25, *, batch_tile=None):
    """images: [B, C, H, W]. Returns the per-pixel quality map [B, 1, H, W] (f32)."""
    B, C, H, W = images.shape
    pad = pool_size // 2
    assert pool_size % 2 == 1, "odd pool_size expected (module default is 25)"
    assert pad < H and pad < W, "ReflectionPad2d needs pool_size//2 < H and < W"

    # Constant banded matrices folding reflection-pad + box-sum; duplicated along K so
    # the in-kernel bf16 hi/lo data split needs only ONE matmul per pass.
    mv = _reflect_box_matrix(H, pad, pool_size)
    mh = _reflect_box_matrix(W, pad, pool_size)
    av2 = jnp.asarray(np.concatenate([mv, mv], axis=1), dtype=jnp.bfloat16)        # [H, 2H]
    aht2 = jnp.asarray(np.concatenate([mh.T, mh.T], axis=0), dtype=jnp.bfloat16)   # [2W, W]

    if batch_tile is None:
        batch_tile = _choose_batch_tile(B, C, H, W, images.dtype.itemsize)
    bt = int(batch_tile)
    assert B % bt == 0, (B, bt)
    n_steps = B // bt

    kernel = functools.partial(_iqa_kernel, pool=pool_size, exposed=float(exposed_level))

    # Advisory cost estimate so XLA can schedule surrounding ops around the call.
    mm_flops = 2 * B * ((2 * H) * (2 * W) * W + H * (2 * H) * (2 * W))
    cost = pl.CostEstimate(
        flops=int(mm_flops + 20 * B * C * H * W),
        transcendentals=int(2 * B * H * W),
        bytes_accessed=int(images.size * images.dtype.itemsize
                           + B * H * W * 4 + (av2.size + aht2.size) * 2),
    )

    # VMEM budget sized to the double-buffered batch tiles + pipeline-resident
    # constants + headroom for in-kernel f32 temporaries.
    work = (2 * (bt * C * H * W * max(images.dtype.itemsize, 4) + bt * H * W * 4)
            + 2 * (av2.size + aht2.size) * 2
            + 12 * bt * H * W * 4)
    vmem_limit = int(min(64 * 2**20, max(32 * 2**20, 2 * work)))

    # TODO(synk): for production frame sizes (e.g. 1080p), add grid axes that row-tile H
    # and column-tile W (TW a multiple of 128/256) with a pool//2 halo fetched via a
    # manual pltpu.make_async_copy from an HBM-resident (memory_space=pl.ANY) image, and
    # slice Av/Ah^T to their per-tile bands (T x (T + 2*pad)).  That fits v7x's 64 MiB
    # VMEM, skips the zero band (~10x fewer MXU MACs at 1080p), removes the constants'
    # double-buffer cost, and makes output stores lane-dense.  The small shapes used
    # here fit a single batch-tiled block, so the halo machinery is not exercised.
    return pl.pallas_call(
        kernel,
        out_shape=jax.ShapeDtypeStruct((B, 1, H, W), jnp.float32),
        grid_spec=pltpu.PrefetchScalarGridSpec(
            num_scalar_prefetch=0,
            grid=(n_steps,),
            in_specs=[
                pl.BlockSpec((H, 2 * H), lambda b: (0, 0)),              # [Av | Av]     (shared)
                pl.BlockSpec((2 * W, W), lambda b: (0, 0)),              # [Ah^T ; Ah^T] (shared)
                pl.BlockSpec((bt, C, H, W), lambda b: (b, 0, 0, 0)),     # batch tile
            ],
            out_specs=pl.BlockSpec((bt, None, H, W), lambda b: (b, 0, 0, 0)),
        ),
        compiler_params=pltpu.CompilerParams(
            dimension_semantics=("parallel",),
            vmem_limit_bytes=vmem_limit,
        ),
        cost_estimate=cost,
    )(av2, aht2, images)


def _reference(images, exposed_level=0.5, pool_size=25):
    """Pure-JAX mirror of the PyTorch forward (reflect pad + avg pool via reduce_window)."""
    eps = 1.0 / 255.0
    pad = pool_size // 2

    def mean_pool(x):
        xpad = jnp.pad(x, ((0, 0), (0, 0), (pad, pad), (pad, pad)), mode="reflect")
        s = lax.reduce_window(xpad, 0.0, lax.add,
                              (1, 1, pool_size, pool_size), (1, 1, 1, 1), "VALID")
        return s / float(pool_size * pool_size)

    max_rgb = jnp.max(images, axis=1, keepdims=True)
    min_rgb = jnp.min(images, axis=1, keepdims=True)
    saturation = (max_rgb - min_rgb + eps) / (max_rgb + eps)
    mean_rgb = jnp.mean(mean_pool(images), axis=1, keepdims=True)
    exposedness = jnp.abs(mean_rgb - exposed_level) + eps
    contrast = jnp.mean(mean_pool(images * images), axis=1, keepdims=True) - mean_rgb ** 2
    return jnp.mean(saturation * contrast / exposedness, axis=1, keepdims=True)


if __name__ == "__main__":
    # The module has no learnable parameters (ReflectionPad2d / AvgPool2d are
    # parameter-free), so only the input needs constructing.
    key = jax.random.PRNGKey(0)
    B, C, H, W = 2, 3, 16, 16            # pool_size=25 -> pad=12 < 16: valid reflect pad
    images = jax.random.uniform(key, (B, C, H, W), dtype=jnp.float32)

    out = jax.block_until_ready(image_quality_assessment(images, 0.5, 25))
    ref = jax.block_until_ready(_reference(images, 0.5, 25))

    assert out.shape == (B, 1, H, W), out.shape
    # contrast = E[x^2] - E[x]^2 is cancellation-prone and the division by exposedness
    # (>= 1/255) amplifies absolute differences up to ~255x, so two correct f32
    # implementations with different summation orders legitimately differ at ~1e-4
    # relative level; tolerance is sized to that conditioning.
    err = float(jnp.max(jnp.abs(out - ref)))
    assert jnp.allclose(out, ref, rtol=5e-3, atol=1e-3), err
    print("KERNEL_OK")
</pallas_src>

<mosaic_0001>
module attributes {stable_mosaic.version = 11 : i64} {
  func.func @_iqa_kernel(%arg0: i32, %arg1: memref<16x32xbf16, #tpu.memory_space<vmem>>, %arg2: memref<32x16xbf16, #tpu.memory_space<vmem>>, %arg3: memref<2x3x16x16xf32, #tpu.memory_space<vmem>>, %arg4: memref<2x1x16x16xf32, #tpu.memory_space<vmem>>) attributes {dimension_semantics = [#tpu.dimension_semantics<parallel>], iteration_bounds = array<i64: 1>, scalar_prefetch = 0 : i64, scratch_operands = 0 : i64, tpu.core_type = #tpu.core_type<tc>, window_params = [{pipeline_mode = #tpu.pipeline_mode<synchronous>, transform_indices = @transform_0, window_bounds = array<i64: 16, 32>}, {pipeline_mode = #tpu.pipeline_mode<synchronous>, transform_indices = @transform_1, window_bounds = array<i64: 32, 16>}, {transform_indices = @transform_2, window_bounds = array<i64: 2, 3, 16, 16>}, {transform_indices = @transform_3, window_bounds = array<i64: 2, 1, 16, 16>}]} {
    %c0 = arith.constant 0 : index
    %c0_0 = arith.constant 0 : index
    %c0_1 = arith.constant 0 : index
    %c0_2 = arith.constant 0 : index
    %0 = vector.load %arg3[%c0, %c0_0, %c0_1, %c0_2] : memref<2x3x16x16xf32, #tpu.memory_space<vmem>>, vector<2x3x16x16xf32>
    %1 = vector.extract_strided_slice %0 {offsets = [0, 0, 0, 0], sizes = [2, 1, 16, 16], strides = [1, 1, 1, 1]} : vector<2x3x16x16xf32> to vector<2x1x16x16xf32>
    %2 = vector.shape_cast %1 : vector<2x1x16x16xf32> to vector<2x16x16xf32>
    %3 = arith.mulf %2, %2 : vector<2x16x16xf32>
    %4 = vector.extract_strided_slice %0 {offsets = [0, 1, 0, 0], sizes = [2, 1, 16, 16], strides = [1, 1, 1, 1]} : vector<2x3x16x16xf32> to vector<2x1x16x16xf32>
    %5 = vector.shape_cast %4 : vector<2x1x16x16xf32> to vector<2x16x16xf32>
    %6 = arith.maximumf %2, %5 : vector<2x16x16xf32>
    %7 = arith.minimumf %2, %5 : vector<2x16x16xf32>
    %8 = arith.addf %2, %5 : vector<2x16x16xf32>
    %9 = arith.mulf %5, %5 : vector<2x16x16xf32>
    %10 = arith.addf %3, %9 : vector<2x16x16xf32>
    %11 = vector.extract_strided_slice %0 {offsets = [0, 2, 0, 0], sizes = [2, 1, 16, 16], strides = [1, 1, 1, 1]} : vector<2x3x16x16xf32> to vector<2x1x16x16xf32>
    %12 = vector.shape_cast %11 : vector<2x1x16x16xf32> to vector<2x16x16xf32>
    %13 = arith.maximumf %6, %12 : vector<2x16x16xf32>
    %14 = arith.minimumf %7, %12 : vector<2x16x16xf32>
    %15 = arith.addf %8, %12 : vector<2x16x16xf32>
    %16 = arith.mulf %12, %12 : vector<2x16x16xf32>
    %17 = arith.addf %10, %16 : vector<2x16x16xf32>
    %18 = arith.subf %13, %14 : vector<2x16x16xf32>
    %cst = arith.constant 0.00392156886 : f32
    %19 = vector.broadcast %cst : f32 to vector<2x16x16xf32>
    %20 = arith.addf %18, %19 : vector<2x16x16xf32>
    %cst_3 = arith.constant 0.00392156886 : f32
    %21 = vector.broadcast %cst_3 : f32 to vector<2x16x16xf32>
    %22 = arith.addf %13, %21 : vector<2x16x16xf32>
    %23 = tpu.reciprocal %22 {approx = true} : vector<2x16x16xf32> -> vector<2x16x16xf32>
    %24 = arith.mulf %22, %23 : vector<2x16x16xf32>
    %cst_4 = arith.constant 2.000000e+00 : f32
    %25 = vector.broadcast %cst_4 : f32 to vector<2x16x16xf32>
    %26 = arith.subf %25, %24 : vector<2x16x16xf32>
    %27 = arith.mulf %23, %26 : vector<2x16x16xf32>
    %28 = arith.mulf %20, %27 : vector<2x16x16xf32>
    %29 = vector.shape_cast %28 : vector<2x16x16xf32> to vector<32x16xf32>
    %cst_5 = arith.constant 0.333333343 : f32
    %30 = vector.broadcast %cst_5 : f32 to vector<2x16x16xf32>
    %31 = arith.mulf %15, %30 : vector<2x16x16xf32>
    %32 = vector.shape_cast %31 : vector<2x16x16xf32> to vector<32x16xf32>
    %cst_6 = arith.constant 0.333333343 : f32
    %33 = vector.broadcast %cst_6 : f32 to vector<2x16x16xf32>
    %34 = arith.mulf %17, %33 : vector<2x16x16xf32>
    %35 = vector.shape_cast %34 : vector<2x16x16xf32> to vector<32x16xf32>
    %36 = tpu.concatenate %32, %35 in 0 : vector<32x16xf32>, vector<32x16xf32> -> vector<64x16xf32>
    %37 = arith.truncf %36 : vector<64x16xf32> to vector<64x16xbf16>
    %38 = arith.extf %37 : vector<64x16xbf16> to vector<64x16xf32>
    %39 = arith.subf %36, %38 : vector<64x16xf32>
    %40 = arith.truncf %39 : vector<64x16xf32> to vector<64x16xbf16>
    %41 = tpu.concatenate %37, %40 in 1 : vector<64x16xbf16>, vector<64x16xbf16> -> vector<64x32xbf16>
    %c0_7 = arith.constant 0 : index
    %c0_8 = arith.constant 0 : index
    %42 = vector.load %arg2[%c0_7, %c0_8] : memref<32x16xbf16, #tpu.memory_space<vmem>>, vector<32x16xbf16>
    %cst_9 = arith.constant dense<0.000000e+00> : vector<64x16xf32>
    %43 = tpu.matmul %41, %42, %cst_9 {dimension_numbers = #tpu.dot_dimension_numbers<[1], [0], [0], [1], [0, 0, 1, 1], [], []>} : vector<64x32xbf16>, vector<32x16xbf16>, vector<64x16xf32> -> vector<64x16xf32>
    %44 = vector.extract_strided_slice %43 {offsets = [0, 0], sizes = [16, 16], strides = [1, 1]} : vector<64x16xf32> to vector<16x16xf32>
    %45 = vector.extract_strided_slice %43 {offsets = [16, 0], sizes = [16, 16], strides = [1, 1]} : vector<64x16xf32> to vector<16x16xf32>
    %46 = vector.extract_strided_slice %43 {offsets = [32, 0], sizes = [16, 16], strides = [1, 1]} : vector<64x16xf32> to vector<16x16xf32>
    %47 = vector.extract_strided_slice %43 {offsets = [48, 0], sizes = [16, 16], strides = [1, 1]} : vector<64x16xf32> to vector<16x16xf32>
    %48 = tpu.concatenate %44, %45, %46, %47 in 1 : vector<16x16xf32>, vector<16x16xf32>, vector<16x16xf32>, vector<16x16xf32> -> vector<16x64xf32>
    %49 = arith.truncf %48 : vector<16x64xf32> to vector<16x64xbf16>
    %50 = arith.extf %49 : vector<16x64xbf16> to vector<16x64xf32>
    %51 = arith.subf %48, %50 : vector<16x64xf32>
    %52 = arith.truncf %51 : vector<16x64xf32> to vector<16x64xbf16>
    %53 = tpu.concatenate %49, %52 in 0 : vector<16x64xbf16>, vector<16x64xbf16> -> vector<32x64xbf16>
    %c0_10 = arith.constant 0 : index
    %c0_11 = arith.constant 0 : index
    %54 = vector.load %arg1[%c0_10, %c0_11] : memref<16x32xbf16, #tpu.memory_space<vmem>>, vector<16x32xbf16>
    %cst_12 = arith.constant dense<0.000000e+00> : vector<16x64xf32>
    %55 = tpu.matmul %54, %53, %cst_12 {dimension_numbers = #tpu.dot_dimension_numbers<[1], [0], [0], [1], [0, 0, 1, 1], [], []>} : vector<16x32xbf16>, vector<32x64xbf16>, vector<16x64xf32> -> vector<16x64xf32>
    %cst_13 = arith.constant 1.600000e-03 : f32
    %56 = vector.broadcast %cst_13 : f32 to vector<16x64xf32>
    %57 = arith.mulf %55, %56 : vector<16x64xf32>
    %58 = vector.extract_strided_slice %57 {offsets = [0, 0], sizes = [16, 16], strides = [1, 1]} : vector<16x64xf32> to vector<16x16xf32>
    %59 = vector.extract_strided_slice %57 {offsets = [0, 16], sizes = [16, 16], strides = [1, 1]} : vector<16x64xf32> to vector<16x16xf32>
    %60 = tpu.concatenate %58, %59 in 0 : vector<16x16xf32>, vector<16x16xf32> -> vector<32x16xf32>
    %61 = vector.extract_strided_slice %57 {offsets = [0, 32], sizes = [16, 16], strides = [1, 1]} : vector<16x64xf32> to vector<16x16xf32>
    %62 = vector.extract_strided_slice %57 {offsets = [0, 48], sizes = [16, 16], strides = [1, 1]} : vector<16x64xf32> to vector<16x16xf32>
    %63 = tpu.concatenate %61, %62 in 0 : vector<16x16xf32>, vector<16x16xf32> -> vector<32x16xf32>
    %cst_14 = arith.constant 5.000000e-01 : f32
    %64 = vector.broadcast %cst_14 : f32 to vector<32x16xf32>
    %65 = arith.subf %60, %64 : vector<32x16xf32>
    %66 = math.absf %65 : vector<32x16xf32>
    %cst_15 = arith.constant 0.00392156886 : f32
    %67 = vector.broadcast %cst_15 : f32 to vector<32x16xf32>
    %68 = arith.addf %66, %67 : vector<32x16xf32>
    %69 = arith.mulf %60, %60 : vector<32x16xf32>
    %70 = arith.subf %63, %69 : vector<32x16xf32>
    %71 = arith.mulf %29, %70 : vector<32x16xf32>
    %72 = tpu.reciprocal %68 {approx = true} : vector<32x16xf32> -> vector<32x16xf32>
    %73 = arith.mulf %68, %72 : vector<32x16xf32>
    %cst_16 = arith.constant 2.000000e+00 : f32
    %74 = vector.broadcast %cst_16 : f32 to vector<32x16xf32>
    %75 = arith.subf %74, %73 : vector<32x16xf32>
    %76 = arith.mulf %72, %75 : vector<32x16xf32>
    %77 = arith.mulf %71, %76 : vector<32x16xf32>
    %78 = vector.shape_cast %77 : vector<32x16xf32> to vector<2x16x16xf32>
    %c0_17 = arith.constant 0 : index
    %c0_18 = arith.constant 0 : index
    %c0_19 = arith.constant 0 : index
    %c0_20 = arith.constant 0 : index
    %79 = vector.load %arg4[%c0_17, %c0_18, %c0_19, %c0_20] : memref<2x1x16x16xf32, #tpu.memory_space<vmem>>, vector<2x1x16x16xf32>
    %80 = vector.shape_cast %79 : vector<2x1x16x16xf32> to vector<2x16x16xf32>
    %81 = vector.shape_cast %78 : vector<2x16x16xf32> to vector<2x1x16x16xf32>
    tpu.vector_store %arg4[%c0_17, %c0_18, %c0_19, %c0_20], %81 {strides = array<i32>} : memref<2x1x16x16xf32, #tpu.memory_space<vmem>>, vector<2x1x16x16xf32>,
    return
  }
  func.func @transform_0(%arg0: i32) -> (i32, i32) {
    %c0_i32 = arith.constant 0 : i32
    %c0_i32_0 = arith.constant 0 : i32
    %c0_i32_1 = arith.constant 0 : i32
    return %c0_i32, %c0_i32_0 : i32, i32
  }
  func.func @transform_1(%arg0: i32) -> (i32, i32) {
    %c0_i32 = arith.constant 0 : i32
    %c0_i32_0 = arith.constant 0 : i32
    %c0_i32_1 = arith.constant 0 : i32
    return %c0_i32, %c0_i32_0 : i32, i32
  }
  func.func @transform_2(%arg0: i32) -> (i32, i32, i32, i32) {
    %c0_i32 = arith.constant 0 : i32
    %c0_i32_0 = arith.constant 0 : i32
    %c0_i32_1 = arith.constant 0 : i32
    %c0_i32_2 = arith.constant 0 : i32
    return %arg0, %c0_i32, %c0_i32_0, %c0_i32_1 : i32, i32, i32, i32
  }
  func.func @transform_3(%arg0: i32) -> (i32, i32, i32, i32) {
    %c0_i32 = arith.constant 0 : i32
    %c0_i32_0 = arith.constant 0 : i32
    %c0_i32_1 = arith.constant 0 : i32
    %c0_i32_2 = arith.constant 0 : i32
    return %arg0, %c0_i32, %c0_i32_0, %c0_i32_1 : i32, i32, i32, i32
  }
}

</mosaic_0001>

<bundles_post_ra>
// kernel: tpu_custom_call.1
= control target key start
LH: loop header
LB: loop body
LE: loop exit
PB: predicated region body
PF: predicated region fallthrough
CT: control target
= control target key end

     0   :  { %8 = vsyncpa [#allocation3], 0  ;;  %s755_s0 = inlined_call_operand.vmem [shape: bf16[16,32], index: 0, kind: input, shape index: {}]   ;;  %s756_s1 = inlined_call_operand.vmem [shape: bf16[32,16], index: 1, kind: input, shape index: {}]   ;;  %s757_s2 = inlined_call_operand.hbm [shape: f32[2,3,16,16], index: 2, kind: input, shape index: {}]   ;;  %s758_s3 = inlined_call_operand.hbm [shape: f32[2,1,16,16], index: 3, kind: output, shape index: {}]  }
   0x1   :  { %9 = vsyncpa [#allocation4], 0  ;;  %s18_s14 = sshll.u32 %s757_s2, 4  ;;  %s564_s15 = smov [#allocation2]   ;;  %s19_s14 = int_to_ptr.hbm [resolvable:$true] %s18_s14 }
   0x2   :  { %s20_s16 = sshll.u32 %s564_s15, 4  ;;  %s565_s17 = smov 128   ;;  %s21_s16 = int_to_ptr.vmem [resolvable:$true] %s20_s16 }
   0x3   :  { %s566_s18 = smov 8  }
   0x4   :  { %26 = dma.hbm_to_vmem [thread:$0]  %s19_s14, 1536, %s21_s16, [#allocation3], %s565_s17, %s565_s17, %s566_s18  }
   0x5   :  { %560 = dma.done.wait [#allocation3], 1536  }
   0x6   :  { %561 = vsyncadd [#allocation3], 4294965760  ;;  %v599_v0 = vld [vmem:[#allocation2 + $0x30] sm:$0xff]  ;;  %v601_v1 = vld [vmem:[#allocation2 + $0x38] sm:$0xff]  ;;  %vm208_vm0 = vcmask 130048   ;;  %vm237_vm1 = vcmask 261120  }
   0x7   :  { %v603_v2 = vld [vmem:[#allocation2 + $0x40] sm:$0xff]  ;;  %v605_v3 = vld [vmem:[#allocation2 + $0x48] sm:$0xff]  ;;  %v607_v4 = vld [vmem:[#allocation2 + $0x50] sm:$0xff]  ;;  %v46_v7 = vmul.f32 %v599_v0, %v599_v0  ;;  %v47_v8 = vmul.f32 %v601_v1, %v601_v1  ;;  %s568_s22 = smov 32   ;;  %s569_s23 = smov 48   ;;  %vm303_vm2 = vcmask 392192  }
   0x8   :  { %v609_v5 = vld [vmem:[#allocation2 + $0x58] sm:$0xff]  ;;  %v58_v6 = vadd.f32 %v603_v2, %v599_v0  ;;  %v62_v9 = vmul.f32 %v603_v2, %v603_v2  ;;  %v59_v10 = vadd.f32 %v605_v3, %v601_v1  ;;  %v63_v11 = vmul.f32 %v605_v3, %v605_v3  ;;  %v627_v14 = vld [vmem:[#allocation2] sm:$0xff]  ;;  %v629_v15 = vld [vmem:[#allocation2 + $0x8] sm:$0xff]  ;;  %s570_s26 = smov 112   ;;  %s572_s27 = smov [#allocation5]  }
   0x9   :  { %v82_v12 = vmul.f32 %v607_v4, %v607_v4  ;;  %v83_v13 = vmul.f32 %v609_v5, %v609_v5  ;;  %v631_v16 = vld [vmem:[#allocation2 + $0x10] sm:$0xff]  ;;  %v634_v19 = vld [vmem:[#allocation2 + $0x18] sm:$0xff]  ;;  %v636_v20 = vld [vmem:[#allocation2 + $0x20] sm:$0xff]  ;;  %v44_v22 = vmul.f32 %v627_v14, %v627_v14  ;;  %v45_v23 = vmul.f32 %v629_v15, %v629_v15  ;;  %s444_s28 = sshll.u32 %s572_s27, 4  ;;  %s446_s4 = sshll.u32 %s758_s3, 4  ;;  %s445_s28 = int_to_ptr.vmem [resolvable:$true] %s444_s28  ;;  %s447_s4 = int_to_ptr.hbm [resolvable:$true] %s446_s4 }
   0xa   :  { %v78_v17 = vadd.f32 %v58_v6, %v607_v4  ;;  %v66_v18 = vadd.f32 %v62_v9, %v46_v7  ;;  %v638_v21 = vld [vmem:[#allocation2 + $0x28] sm:$0xff]  ;;  %v79_v24 = vadd.f32 %v59_v10, %v609_v5  ;;  %v67_v25 = vadd.f32 %v63_v11, %v47_v8  ;;  %v480_v37 = vld [vmem:[%s756_s1] sm:$0xff] }
   0xb   :  { %v60_v26 = vmul.f32 %v631_v16, %v631_v16  ;;  %v61_v27 = vmul.f32 %v634_v19, %v634_v19  ;;  %v481_v28 = vld [vmem:[%s756_s1 + $0x8] sm:$0xff]  ;;  %v80_v31 = vmul.f32 %v636_v20, %v636_v20  ;;  %v81_v32 = vmul.f32 %v638_v21, %v638_v21  ;;  %s567_s1 = smov 16  }
   0xc   :  { %v122_v29 = vmul.f32 0.33333334, %v78_v17  ;;  %v86_v30 = vadd.f32 %v82_v12, %v66_v18  ;;  %v123_v33 = vmul.f32 0.33333334, %v79_v24  ;;  %v87_v34 = vadd.f32 %v83_v13, %v67_v25  ;;  %483 = vmatpush.bf16.msra.mxu2 %v481_v28  ;;  %484 = vmatpush.bf16.msra.mxu3 %v481_v28 }
   0xd   :  { %v64_v35 = vadd.f32 %v60_v26, %v44_v22  ;;  %v65_v36 = vadd.f32 %v61_v27, %v45_v23  ;;  %v56_v40 = vadd.f32 %v631_v16, %v627_v14  ;;  %v57_v41 = vadd.f32 %v634_v19, %v629_v15  ;;  %252 = vmatpush.bf16.msra.mxu0 %v481_v28 }
   0xe   :  { %v659_v38 = vpack.c.bf16 %v122_v29, %v122_v29  ;;  %v126_v39 = vmul.f32 0.33333334, %v86_v30  ;;  %v665_v42 = vpack.c.bf16 %v123_v33, %v123_v33  ;;  %v127_v43 = vmul.f32 0.33333334, %v87_v34 }
   0xf   :  { %v84_v44 = vadd.f32 %v80_v31, %v64_v35  ;;  %v85_v45 = vadd.f32 %v81_v32, %v65_v36  ;;  %v76_v48 = vadd.f32 %v56_v40, %v636_v20  ;;  %v77_v49 = vadd.f32 %v57_v41, %v638_v21 }
  0x10   :  { %v138_v46 = vunpack.c.l.bf16 %v659_v38  ;;  %v668_v47 = vpack.c.bf16 %v126_v39, %v126_v39  ;;  %v139_v50 = vunpack.c.l.bf16 %v665_v42  ;;  %v135_v51 = vpack.c.bf16 %v127_v43, %v127_v43  ;;  %485 = vmatpush.bf16.msra.mxu2 %v480_v37  ;;  %486 = vmatpush.bf16.msra.mxu3 %v480_v37 }
  0x11   :  { %v124_v52 = vmul.f32 0.33333334, %v84_v44  ;;  %v125_v53 = vmul.f32 0.33333334, %v85_v45  ;;  %v120_v56 = vmul.f32 0.33333334, %v76_v48  ;;  %253 = vmatpush.bf16.msra.mxu0 %v480_v37  ;;  %v170_v44 = vunpack.c.l.b16 %v659_v38 }
  0x12   :  { %v146_v54 = vsub.f32 %v122_v29, %v138_v46  ;;  %v142_v55 = vunpack.c.l.bf16 %v668_v47  ;;  %v121_v57 = vmul.f32 0.33333334, %v77_v49  ;;  %v147_v58 = vsub.f32 %v123_v33, %v139_v50 }
  0x13   :  { %v143_v59 = vunpack.c.l.bf16 %v135_v51  ;;  %v132_v60 = vpack.c.bf16 %v124_v52, %v124_v52  ;;  %v133_v61 = vpack.c.bf16 %v125_v53, %v125_v53  ;;  %v128_v6 = vpack.c.bf16 %v120_v56, %v120_v56 }
  0x14   :  { %v154_v62 = vpack.c.bf16 %v146_v54, %v146_v54  ;;  %v150_v63 = vsub.f32 %v126_v39, %v142_v55  ;;  %v129_v7 = vpack.c.bf16 %v121_v57, %v121_v57  ;;  %v155_v8 = vpack.c.bf16 %v147_v58, %v147_v58 }
  0x15   :  { %v151_v9 = vsub.f32 %v127_v43, %v143_v59  ;;  %v140_v10 = vunpack.c.l.bf16 %v132_v60  ;;  %v141_v11 = vunpack.c.l.bf16 %v133_v61  ;;  %v136_v17 = vunpack.c.l.bf16 %v128_v6 }
  0x16   :  { %v190_v12 = vunpack.c.l.b16 %v154_v62  ;;  %v158_v13 = vpack.c.bf16 %v150_v63, %v150_v63  ;;  %v137_v18 = vunpack.c.l.bf16 %v129_v7  ;;  %v191_v22 = vunpack.c.l.b16 %v155_v8 }
  0x17   :  { %v159_v23 = vpack.c.bf16 %v151_v9, %v151_v9  ;;  %v148_v24 = vsub.f32 %v124_v52, %v140_v10  ;;  %v149_v25 = vsub.f32 %v125_v53, %v141_v11  ;;  %v144_v27 = vsub.f32 %v120_v56, %v136_v17 }
  0x18   :  { %v194_v26 = vunpack.c.l.b16 %v158_v13  ;;  %v145_v28 = vsub.f32 %v121_v57, %v137_v18  ;;  %v197_v29 = vpack.c.b16 %v191_v22, %v190_v12  ;;  %v171_v45 = vunpack.c.l.b16 %v665_v42 }
  0x19   :  { %v195_v30 = vunpack.c.l.b16 %v159_v23  ;;  %v156_v31 = vpack.c.bf16 %v148_v24, %v148_v24  ;;  %v157_v32 = vpack.c.bf16 %v149_v25, %v149_v25  ;;  %v152_v33 = vpack.c.bf16 %v144_v27, %v144_v27 }
  0x1a   :  { %v153_v34 = vpack.c.bf16 %v145_v28, %v145_v28  ;;  %202 = vrot.lane.b32.xlu0 %v197_v29, %s567_s1  ;;  %v174_v46 = vunpack.c.l.b16 %v668_v47  ;;  %v175_v48 = vunpack.c.l.b16 %v135_v51  ;;  %v177_v49 = vpack.c.b16 %v171_v45, %v170_v44 }
  0x1b   :  { %v199_v35 = vpack.c.b16 %v195_v30, %v194_v26  ;;  %v192_v36 = vunpack.c.l.b16 %v156_v31  ;;  %v193_v37 = vunpack.c.l.b16 %v157_v32  ;;  %v188_v39 = vunpack.c.l.b16 %v152_v33 }
  0x1c   :  { %v189_v40 = vunpack.c.l.b16 %v153_v34  ;;  %v179_v50 = vpack.c.b16 %v175_v48, %v174_v46  ;;  %v168_v56 = vunpack.c.l.b16 %v128_v6  ;;  %v169_v57 = vunpack.c.l.b16 %v129_v7  ;;  %v482_v46 = vld [vmem:[%s755_s0] sm:$0xff]  ;;  %s571_s0 = smov 96  }
  0x1d   :  { %206 = vrot.lane.b32.xlu1 %v199_v35, %s567_s1  ;;  %v198_v41 = vpack.c.b16 %v193_v37, %v192_v36  ;;  %v172_v38 = vunpack.c.l.b16 %v132_v60  ;;  %v173_v42 = vunpack.c.l.b16 %v133_v61 }
  0x1e   :  { %v196_v43 = vpack.c.b16 %v189_v40, %v188_v39  ;;  %v176_v47 = vpack.c.b16 %v169_v57, %v168_v56 }
  0x1f   :  { %v178_v58 = vpack.c.b16 %v173_v42, %v172_v38 }
  0x22   :  { %204 = vrot.lane.b32.xlu0 %v198_v41, %s567_s1 }
  0x25   :  { %200 = vrot.lane.b32.xlu1 %v196_v43, %s567_s1 }
  0x8c   :  { %v203_v52 = vpop.permute.xlu0 %202 }
  0x8d   :  { %v214_v53 = vsel %vm208_vm0, %v177_v49, %v203_v52 }
  0x8e   :  { %468 = vmatmul.msk.bf16.vlgmr.msra.gmra.mxu2 %vm237_vm1, %v214_v53 }
  0x8f   :  { %v207_v54 = vpop.permute.xlu1 %206 }
  0x90   :  { %v220_v55 = vsel %vm208_vm0, %v179_v50, %v207_v54 }
  0x91   :  { %470 = vmatmul.msk.bf16.vlgmr.msra.gmra.mxu3 %vm237_vm1, %v220_v55 }
  0x94   :  { %v205_v62 = vpop.permute.xlu0 %204 }
  0x95   :  { %v217_v63 = vsel %vm208_vm0, %v178_v58, %v205_v62 }
  0x97   :  { %v201_v51 = vpop.permute.xlu1 %200 }
  0x98   :  { %v211_v59 = vsel %vm208_vm0, %v176_v47, %v201_v51 }
  0x99   :  { %467 = vmatmul.msk.bf16.vlgmr.msra.gmra.mxu0 %vm237_vm1, %v211_v59  ;;  %v49_v59 = vmax.f32 %v629_v15, %v634_v19 }
  0x9b   :  { %v69_v62 = vmax.f32 %v49_v59, %v638_v21 }
  0x9e   :  { %469 = vmatmul.msk.bf16.gmra.mxu2 %vm237_vm1, %v217_v63 }
 0x111   :  { %v260_v8 = vpop.f32.mrf.mxu2 }
 0x112   :  { %277 = vrot.lane.b32.xlu2 %v260_v8, %s567_s1  ;;  %v97_v8 = vadd.f32 0.003921569, %v69_v62 }
 0x114   :  { %v270_v60 = vpop.f32.mrf.mxu3  ;;  %496 = vrcp.f32 %v97_v8 }
 0x116   :  { %v255_v12 = vpop.f32.mrf.mxu0 }
 0x119   :  { %v262_v6 = vpop.f32.mrf.mxu2 }
 0x11a   :  { %279 = vrot.lane.b32.xlu2 %v262_v6, %s567_s1 }
 0x11c   :  { %v272_v7 = vpop.f32.mrf.mxu3 }
 0x11e   :  { %v257_v25 = vpop.f32.mrf.mxu0 }
 0x121   :  { %v265_v61 = vpop.f32.mrf.mxu2 }
 0x122   :  { %285 = vrot.lane.b32.xlu0 %v265_v61, %s568_s22  ;;  %293 = vrot.lane.b32.xlu2 %v270_v60, %s569_s23  ;;  %v48_v61 = vmax.f32 %v627_v14, %v631_v16 }
 0x129   :  { %v267_v9 = vpop.f32.mrf.mxu2 }
 0x12a   :  { %295 = vrot.lane.b32.xlu0 %v272_v7, %s569_s23  ;;  %287 = vrot.lane.b32.xlu1 %v267_v9, %s568_s22  ;;  %v53_v7 = vmin.f32 %v629_v15, %v634_v19  ;;  %v497_v9 = vpop.eup %496 }
 0x16c   :  { %v278_v10 = vpop.permute.xlu2 %277 }
 0x16d   :  { %v299_v13 = vsel %vm208_vm0, %v255_v12, %v278_v10  ;;  %v68_v10 = vmax.f32 %v48_v61, %v636_v20  ;;  %v105_v12 = vmul.f32 %v497_v9, %v97_v8 }
 0x174   :  { %v280_v11 = vpop.permute.xlu2 %279 }
 0x175   :  { %v300_v27 = vsel %vm208_vm0, %v257_v25, %v280_v11  ;;  %v73_v11 = vmin.f32 %v53_v7, %v638_v21  ;;  %v52_v21 = vmin.f32 %v627_v14, %v631_v16 }
 0x17c   :  { %v294_v18 = vpop.permute.xlu2 %293 }
 0x194   :  { %v286_v17 = vpop.permute.xlu0 %285 }
 0x195   :  { %v301_v22 = vsel %vm237_vm1, %v299_v13, %v286_v17  ;;  %v96_v17 = vadd.f32 0.003921569, %v68_v10 }
 0x196   :  { %v304_v23 = vsel %vm303_vm2, %v301_v22, %v294_v18  ;;  %v89_v18 = vsub.f32 %v69_v62, %v73_v11  ;;  %v109_v22 = vsub.f32 2.0, %v105_v12  ;;  %v55_v11 = vmin.f32 %v601_v1, %v605_v3 }
 0x197   :  { %v306_v24 = vpack.c.bf16 %v304_v23, %v304_v23 }
 0x198   :  { %v93_v15 = vadd.f32 0.003921569, %v89_v18  ;;  %v113_v19 = vmul.f32 %v497_v9, %v109_v22 }
 0x199   :  { %v308_v26 = vunpack.c.l.bf16 %v306_v24  ;;  %v316_v44 = vunpack.c.l.b16 %v306_v24 }
 0x19b   :  { %v310_v33 = vsub.f32 %v304_v23, %v308_v26 }
 0x19c   :  { %v296_v28 = vpop.permute.xlu0 %295  ;;  %v288_v29 = vpop.permute.xlu1 %287 }
 0x19d   :  { %v302_v30 = vsel %vm237_vm1, %v300_v27, %v288_v29  ;;  %v312_v36 = vpack.c.bf16 %v310_v33, %v310_v33  ;;  %v117_v29 = vmul.f32 %v113_v19, %v93_v15 }
 0x19e   :  { %v305_v31 = vsel %vm303_vm2, %v302_v30, %v296_v28 }
 0x19f   :  { %v307_v32 = vpack.c.bf16 %v305_v31, %v305_v31  ;;  %v322_v39 = vunpack.c.l.b16 %v312_v36 }
 0x1a1   :  { %v309_v34 = vunpack.c.l.bf16 %v307_v32  ;;  %v317_v43 = vunpack.c.l.b16 %v307_v32 }
 0x1a3   :  { %v311_v35 = vsub.f32 %v305_v31, %v309_v34  ;;  %v318_v45 = vpack.c.b16 %v317_v43, %v316_v44 }
 0x1a5   :  { %v313_v37 = vpack.c.bf16 %v311_v35, %v311_v35 }
 0x1a7   :  { %v323_v40 = vunpack.c.l.b16 %v313_v37  ;;  %v72_v37 = vmin.f32 %v52_v21, %v636_v20  ;;  %v50_v20 = vmax.f32 %v599_v0, %v603_v2 }
 0x1a9   :  { %v324_v41 = vpack.c.b16 %v323_v40, %v322_v39 }
 0x1ab   :  { %342 = vmatpush.bf16.msra.mxu1 %v324_v41  ;;  %v88_v41 = vsub.f32 %v68_v10, %v72_v37 }
 0x1ad   :  { %v92_v14 = vadd.f32 0.003921569, %v88_v41 }
 0x1af   :  { %343 = vmatpush.bf16.msra.mxu1 %v318_v45 }
 0x1b2   :  { %475 = vmatmul.msk.bf16.vlgmr.msra.gmra.mxu1 %vm237_vm1, %v482_v46 }
 0x22f   :  { %v345_v48 = vpop.f32.mrf.mxu1 }
 0x230   :  { %v350_v49 = vmul.f32 0.0016, %v345_v48 }
 0x232   :  { %354 = vrot.lane.b32.xlu1 %v350_v49, %s570_s26  ;;  %v372_v50 = vmul.f32 %v350_v49, %v350_v49  ;;  %v476_v13 = vadd.f32 -0.5, %v350_v49 }
 0x234   :  { %380 = vrot.lane.b32.xlu0 %v372_v50, %s568_s22  ;;  %v364_v26 = vand.u32 2147483647, %v476_v13 }
 0x236   :  { %v368_v28 = vadd.f32 0.003921569, %v364_v26 }
 0x237   :  { %v347_v52 = vpop.f32.mrf.mxu1 }
 0x238   :  { %v351_v53 = vmul.f32 0.0016, %v347_v52 }
 0x23a   :  { %356 = vrot.lane.b32.xlu2 %v351_v53, %s570_s26  ;;  %v373_v54 = vmul.f32 %v351_v53, %v351_v53  ;;  %v477_v63 = vadd.f32 -0.5, %v351_v53 }
 0x23c   :  { %382 = vrot.lane.b32.xlu1 %v373_v54, %s568_s22  ;;  %v365_v6 = vand.u32 2147483647, %v477_v63  ;;  %v70_v54 = vmax.f32 %v50_v20, %v607_v4  ;;  %v54_v63 = vmin.f32 %v599_v0, %v603_v2  ;;  %v75_v0 = vmin.f32 %v55_v11, %v609_v5 }
 0x23e   :  { %v369_v60 = vadd.f32 0.003921569, %v365_v6 }
 0x240   :  { %498 = vrcp.f32 %v369_v60 }
 0x241   :  { %500 = vrcp.f32 %v96_v17 }
 0x242   :  { %502 = vrcp.f32 %v368_v28 }
 0x246   :  { %v499_v23 = vpop.eup %498 }
 0x247   :  { %v421_v27 = vmul.f32 %v499_v23, %v369_v60  ;;  %v501_v31 = vpop.eup %500 }
 0x248   :  { %v104_v39 = vmul.f32 %v501_v31, %v96_v17  ;;  %v503_v44 = vpop.eup %502 }
 0x249   :  { %v425_v30 = vsub.f32 2.0, %v421_v27  ;;  %v420_v45 = vmul.f32 %v503_v44, %v368_v28 }
 0x24a   :  { %v108_v43 = vsub.f32 2.0, %v104_v39 }
 0x24b   :  { %v429_v36 = vmul.f32 %v499_v23, %v425_v30  ;;  %v424_v48 = vsub.f32 2.0, %v420_v45 }
 0x24c   :  { %v112_v16 = vmul.f32 %v501_v31, %v108_v43 }
 0x24d   :  { %v428_v50 = vmul.f32 %v503_v44, %v424_v48 }
 0x24e   :  { %v116_v46 = vmul.f32 %v112_v16, %v92_v14 }
 0x294   :  { %v703_v55 = vpop.permute.xlu2 %356 }
 0x295   :  { %v375_v56 = vmul.f32 %v703_v55, %v703_v55 }
 0x297   :  { %386 = vrot.lane.b32.xlu0 %v375_v56, %s568_s22 }
 0x2a4   :  { %v708_v57 = vpop.permute.xlu1 %354 }
 0x2a5   :  { %v374_v38 = vmul.f32 %v708_v57, %v708_v57  ;;  %v478_v56 = vadd.f32 -0.5, %v708_v57 }
 0x2a6   :  { %v381_v42 = vpop.permute.xlu0 %380 }
 0x2a7   :  { %v392_v47 = vsub.f32 %v350_v49, %v381_v42  ;;  %384 = vrot.lane.b32.xlu2 %v374_v38, %s568_s22  ;;  %v98_v38 = vadd.f32 0.003921569, %v70_v54  ;;  %v51_v42 = vmax.f32 %v601_v1, %v605_v3 }
 0x2a9   :  { %400 = vrot.lane.b32.xlu1 %v392_v47, %s571_s0  ;;  %v366_v47 = vand.u32 2147483647, %v478_v56  ;;  %504 = vrcp.f32 %v98_v38 }
 0x2ab   :  { %v370_v59 = vadd.f32 0.003921569, %v366_v47 }
 0x2ad   :  { %506 = vrcp.f32 %v370_v59 }
 0x2ae   :  { %v383_v51 = vpop.permute.xlu1 %382 }
 0x2af   :  { %v393_v58 = vsub.f32 %v351_v53, %v383_v51  ;;  %v71_v51 = vmax.f32 %v51_v42, %v609_v5  ;;  %v505_v8 = vpop.eup %504 }
 0x2b0   :  { %v106_v60 = vmul.f32 %v505_v8, %v98_v38 }
 0x2b1   :  { %402 = vrot.lane.b32.xlu2 %v393_v58, %s571_s0  ;;  %v479_v58 = vadd.f32 -0.5, %v703_v55  ;;  %v99_v62 = vadd.f32 0.003921569, %v71_v51 }
 0x2b2   :  { %v110_v10 = vsub.f32 2.0, %v106_v60 }
 0x2b3   :  { %v367_v6 = vand.u32 2147483647, %v479_v58  ;;  %508 = vrcp.f32 %v99_v62  ;;  %v507_v7 = vpop.eup %506 }
 0x2b4   :  { %v422_v12 = vmul.f32 %v507_v7, %v370_v59  ;;  %v114_v17 = vmul.f32 %v505_v8, %v110_v10 }
 0x2b5   :  { %v371_v61 = vadd.f32 0.003921569, %v367_v6 }
 0x2b6   :  { %v426_v23 = vsub.f32 2.0, %v422_v12 }
 0x2b7   :  { %510 = vrcp.f32 %v371_v61 }
 0x2b8   :  { %v430_v15 = vmul.f32 %v507_v7, %v426_v23 }
 0x301   :  { %v385_v24 = vpop.permute.xlu2 %384 }
 0x302   :  { %v394_v25 = vsub.f32 %v708_v57, %v385_v24  ;;  %v74_v57 = vmin.f32 %v54_v63, %v607_v4  ;;  %v91_v4 = vsub.f32 %v71_v51, %v75_v0 }
 0x304   :  { %404 = vrot.lane.b32.xlu0 %v394_v25, %s571_s0  ;;  %v90_v9 = vsub.f32 %v70_v54, %v74_v57  ;;  %v95_v27 = vadd.f32 0.003921569, %v91_v4 }
 0x306   :  { %v94_v13 = vadd.f32 0.003921569, %v90_v9 }
 0x308   :  { %v118_v22 = vmul.f32 %v114_v17, %v94_v13 }
 0x309   :  { %v387_v32 = vpop.permute.xlu0 %386 }
 0x30a   :  { %v395_v33 = vsub.f32 %v703_v55, %v387_v32  ;;  %v509_v55 = vpop.eup %508 }
 0x30b   :  { %v403_v34 = vpop.permute.xlu2 %402  ;;  %v107_v2 = vmul.f32 %v509_v55, %v99_v62  ;;  %v511_v18 = vpop.eup %510 }
 0x30c   :  { %v413_v35 = vmul.f32 %v403_v34, %v117_v29  ;;  %406 = vrot.lane.b32.xlu1 %v395_v33, %s571_s0  ;;  %v423_v25 = vmul.f32 %v511_v18, %v371_v61 }
 0x30d   :  { %v111_v24 = vsub.f32 2.0, %v107_v2 }
 0x30e   :  { %v433_v40 = vmul.f32 %v429_v36, %v413_v35  ;;  %v427_v29 = vsub.f32 2.0, %v423_v25 }
 0x30f   :  { %v115_v28 = vmul.f32 %v509_v55, %v111_v24 }
 0x310   :  { %437 = vst.msk [vmem:[#allocation5 + $0x8] sm:$0xff] %vm208_vm0, %v433_v40  ;;  %v431_v5 = vmul.f32 %v511_v18, %v427_v29 }
 0x311   :  { %v119_v3 = vmul.f32 %v115_v28, %v95_v27 }
 0x31b   :  { %v401_v49 = vpop.permute.xlu1 %400 }
 0x31c   :  { %v412_v52 = vmul.f32 %v401_v49, %v116_v46 }
 0x31e   :  { %v432_v53 = vmul.f32 %v428_v50, %v412_v52 }
 0x320   :  { %436 = vst.msk [vmem:[#allocation5] sm:$0xff] %vm208_vm0, %v432_v53 }
 0x376   :  { %v405_v26 = vpop.permute.xlu0 %404 }
 0x377   :  { %v414_v19 = vmul.f32 %v405_v26, %v118_v22 }
 0x379   :  { %v434_v1 = vmul.f32 %v430_v15, %v414_v19 }
 0x37b   :  { %438 = vst.msk [vmem:[#allocation5 + $0x10] sm:$0xff] %vm208_vm0, %v434_v1 }
 0x37e   :  { %v407_v30 = vpop.permute.xlu1 %406 }
 0x37f   :  { %v415_v21 = vmul.f32 %v407_v30, %v119_v3 }
 0x381   :  { %v435_v31 = vmul.f32 %v431_v5, %v415_v21 }
 0x383   :  { %439 = vst.msk [vmem:[#allocation5 + $0x18] sm:$0xff] %vm208_vm0, %v435_v31 }
 0x384   :  { %452 = dma.vmem_to_hbm [thread:$0]  %s445_s28, 512, %s447_s4, [#allocation4], %s565_s17, %s565_s17, %s566_s18  }
 0x385   :  { %562 = dma.done.wait [#allocation4], 512  }
 0x386   :  { %563 = vsyncadd [#allocation4], 4294966784 }
 0x387   :  { %457 = vsyncpa [#allocation3], 1 }
 0x388   :  { %458 = vsyncpa [#allocation4], 1 }

</bundles_post_ra>
